<compile_context>
chip_gen: v7x
topology: tpu7x:2x2x1
jax: 0.10.0
libtpu: 0.0.40
codegen_flags: <defaults>
</compile_context>

<pallas_src>
import numpy as np
import jax
import jax.numpy as jnp
from jax.experimental import pallas as pl
from jax.experimental.pallas import tpu as pltpu

# Small, forward-consistent shapes (the module's item_ids list is empty, so
# input_size is synthetic here).
SEQ, BATCH, INPUT, HIDDEN, LAYERS, OUTPUT = 8, 2, 4, 32, 3, 1

LANES = 128                       # lane width; padded width of the fused state (L*H = 96 <= 128)
INPUT_PAD = 8                     # sublane-aligned feature pad for the layer-0 projection

# Packed-parameter row layout (single (P_ROWS, 128) f32 operand, one DMA).
ROW_WBIG = 0                      # rows [0,128): block recurrence matrix W_big
ROW_WIH0 = LANES                  # rows [128,136): layer-0 W_ih^T (INPUT_PAD rows), cols 0:H
ROW_BIAS = ROW_WIH0 + INPUT_PAD   # 136: [b0 | b1 | b2 | 0]  (b_l = b_ih_l + b_hh_l)
ROW_FCW = ROW_BIAS + 1            # 137: fc weight row, aligned to the layer L-1 block
ROW_FCB = ROW_FCW + 1             # 138: fc bias replicated across all lanes
ROW_MASK = ROW_FCB + 1            # 139..142: edge-diagonal activity masks (0/1)
N_MASK = 2 * (LAYERS - 1)
P_ROWS = ((ROW_MASK + N_MASK + 7) // 8) * 8   # 144


def rnn_fused_kernel(x_ref, p_ref, out_ref):
    """Fused 3-layer Elman RNN (tanh) + Linear head, wavefront over (layer, time).

    x_ref   : (S*B, INPUT_PAD)  input rows, time-major, zero-padded features
    p_ref   : (P_ROWS, 128)     packed parameters (see init_params)
    out_ref : (B, 128)          fc output replicated across lanes (lane-dense store)
    """
    B = out_ref.shape[0]
    SB, n_in = x_ref.shape
    S = SB // B
    H, L = HIDDEN, LAYERS

    # One inbound DMA; static slices of the packed parameter block.
    w_big = p_ref[ROW_WBIG:ROW_WBIG + LANES, :]          # (128,128) block recurrence matrix
    wih0 = p_ref[ROW_WIH0:ROW_WIH0 + n_in, :]            # (INPUT_PAD,128): cols 0:H = W_ih0^T
    bias = p_ref[ROW_BIAS:ROW_BIAS + 1, :]               # (1,128): [b0 | b1 | b2 | 0]
    fcw = p_ref[ROW_FCW:ROW_FCW + 1, :]                  # (1,128): fc weight in cols (L-1)H:LH
    fcb = p_ref[ROW_FCB:ROW_FCB + 1, :]                  # (1,128): fc bias in every lane

    # Layer-0 input projection for the whole sequence: ONE MXU matmul, all
    # biases folded.  Row d*B+b = [x_t @ W_ih0^T + b0 | b1 | b2 | 0] is the
    # per-diagonal additive term; padding lanes stay exactly 0.
    pre = jnp.dot(x_ref[...], wih0, preferred_element_type=jnp.float32) + bias   # (S*B, 128)

    # Fused wavefront: diagonal d updates layer l at time t = d - l for every
    # active l simultaneously via one (B,128)@(128,128) dot + one tanh.
    h_all = jnp.zeros((B, LANES), jnp.float32)           # [h0 | h1 | h2 | 0-pad]
    for d in range(S + L - 1):
        inp = pre[d * B:(d + 1) * B, :] if d < S else bias
        h_new = jnp.tanh(
            jnp.dot(h_all, w_big, preferred_element_type=jnp.float32) + inp)
        if d < L - 1:                       # leading edge: layers > d not started yet
            m = p_ref[ROW_MASK + d:ROW_MASK + d + 1, :]
        elif d >= S:                        # trailing edge: layers < d-S+1 already done
            r = ROW_MASK + (L - 1) + (d - S)
            m = p_ref[r:r + 1, :]
        else:                               # interior diagonals: all layers active
            m = None
        h_all = h_new if m is None else h_all + m * (h_new - h_all)

    # fc(rnn_out[-1, :]): weight row is zero outside the layer-(L-1) block, so a
    # VPU multiply + lane reduce does the (B,H)@(H,1) product; output is written
    # lane-dense (every lane holds the scalar answer), wrapper slices [:, :1].
    out_ref[...] = jnp.sum(h_all * fcw, axis=-1, keepdims=True) + fcb


@jax.jit
def price_predictor_forward(x, packed_params):
    """x: (SEQ, BATCH, INPUT) float32 -> (BATCH, OUTPUT) float32."""
    S, B, _ = x.shape
    x2d = x.astype(jnp.float32).reshape(S * B, INPUT)
    x2d = jnp.pad(x2d, ((0, 0), (0, INPUT_PAD - INPUT)))   # tiny pad, fused under jit

    vmem = pl.BlockSpec(memory_space=pltpu.MemorySpace.VMEM)
    out_full = pl.pallas_call(
        rnn_fused_kernel,
        out_shape=jax.ShapeDtypeStruct((B, LANES), jnp.float32),
        in_specs=[vmem, vmem],
        out_specs=vmem,
    )(x2d, packed_params)
    return out_full[:, :OUTPUT]


def init_params(key):
    """PyTorch-style U(-1/sqrt(H), 1/sqrt(H)) init; returns (packed, raw) params."""
    bound = 1.0 / np.sqrt(HIDDEN)
    keys = jax.random.split(key, 4 * LAYERS + 2)
    k = iter(keys)

    def u(shape):
        return np.asarray(jax.random.uniform(next(k), shape, jnp.float32, -bound, bound))

    w_ih, w_hh, b = [], [], []
    for l in range(LAYERS):
        in_dim = INPUT if l == 0 else HIDDEN
        w_ih.append(u((HIDDEN, in_dim)))            # torch layout (H, in)
        w_hh.append(u((HIDDEN, HIDDEN)))            # torch layout (H, H)
        b.append(u((HIDDEN,)) + u((HIDDEN,)))       # b_ih + b_hh
    fc_w = u((OUTPUT, HIDDEN))                      # torch layout (O, H)
    fc_b = u((OUTPUT,))

    packed = np.zeros((P_ROWS, LANES), np.float32)
    # Block recurrence matrix: diagonal blocks = W_hh^T, sub-diagonal = W_ih^T.
    for l in range(LAYERS):
        packed[l * HIDDEN:(l + 1) * HIDDEN, l * HIDDEN:(l + 1) * HIDDEN] = w_hh[l].T
        if l >= 1:
            packed[(l - 1) * HIDDEN:l * HIDDEN, l * HIDDEN:(l + 1) * HIDDEN] = w_ih[l].T
    # Layer-0 input weights (feature-padded rows stay zero).
    packed[ROW_WIH0:ROW_WIH0 + INPUT, 0:HIDDEN] = w_ih[0].T
    # Concatenated biases.
    for l in range(LAYERS):
        packed[ROW_BIAS, l * HIDDEN:(l + 1) * HIDDEN] = b[l]
    # fc weight aligned to the last layer's block; fc bias replicated over lanes.
    packed[ROW_FCW, (LAYERS - 1) * HIDDEN:LAYERS * HIDDEN] = fc_w[0]
    packed[ROW_FCB, :] = fc_b[0]
    # Edge-diagonal activity masks (first and last LAYERS-1 diagonals).
    edge_diags = list(range(LAYERS - 1)) + list(range(SEQ, SEQ + LAYERS - 1))
    for i, d in enumerate(edge_diags):
        lo = max(0, d - SEQ + 1) * HIDDEN
        hi = min(LAYERS, d + 1) * HIDDEN
        packed[ROW_MASK + i, lo:hi] = 1.0

    return jnp.asarray(packed), (w_ih, w_hh, b, fc_w, fc_b)


def reference_forward(x, ref_params):
    """Pure-JAX reference with nn.RNN(tanh, 3 layers) + Linear semantics."""
    w_ih, w_hh, b, fc_w, fc_b = ref_params
    seq = x.astype(jnp.float32)                     # (S, B, INPUT)
    for l in range(LAYERS):
        h = jnp.zeros((x.shape[1], HIDDEN), jnp.float32)
        outs = []
        for t in range(x.shape[0]):
            h = jnp.tanh(seq[t] @ w_ih[l].T + h @ w_hh[l].T + b[l])
            outs.append(h)
        seq = jnp.stack(outs)
    return seq[-1] @ fc_w.T + fc_b


if __name__ == "__main__":
    key = jax.random.PRNGKey(0)
    k_param, k_x = jax.random.split(key)
    packed, ref_params = init_params(k_param)
    x = jax.random.normal(k_x, (SEQ, BATCH, INPUT), jnp.float32)

    out = price_predictor_forward(x, packed)
    out = jax.block_until_ready(out)

    ref = reference_forward(x, ref_params)
    assert out.shape == (BATCH, OUTPUT)
    assert np.allclose(np.asarray(out), np.asarray(ref), rtol=1e-3, atol=1e-3)
    print("KERNEL_OK")
</pallas_src>

<mosaic_0001>
module attributes {stable_mosaic.version = 11 : i64} {
  func.func @rnn_fused_kernel(%arg0: memref<16x8xf32, #tpu.memory_space<vmem>>, %arg1: memref<144x128xf32, #tpu.memory_space<vmem>>, %arg2: memref<2x128xf32, #tpu.memory_space<vmem>>) attributes {dimension_semantics = [], scalar_prefetch = 0 : i64, scratch_operands = 0 : i64, tpu.core_type = #tpu.core_type<tc>} {
    %c0 = arith.constant 0 : index
    %c0_0 = arith.constant 0 : index
    %0 = vector.load %arg1[%c0, %c0_0] : memref<144x128xf32, #tpu.memory_space<vmem>>, vector<128x128xf32>
    %c128 = arith.constant 128 : index
    %c0_1 = arith.constant 0 : index
    %1 = vector.load %arg1[%c128, %c0_1] : memref<144x128xf32, #tpu.memory_space<vmem>>, vector<8x128xf32>
    %c136 = arith.constant 136 : index
    %c0_2 = arith.constant 0 : index
    %2 = vector.load %arg1[%c136, %c0_2] : memref<144x128xf32, #tpu.memory_space<vmem>>, vector<1x128xf32>
    %c137 = arith.constant 137 : index
    %c0_3 = arith.constant 0 : index
    %3 = vector.load %arg1[%c137, %c0_3] : memref<144x128xf32, #tpu.memory_space<vmem>>, vector<1x128xf32>
    %c138 = arith.constant 138 : index
    %c0_4 = arith.constant 0 : index
    %4 = vector.load %arg1[%c138, %c0_4] : memref<144x128xf32, #tpu.memory_space<vmem>>, vector<1x128xf32>
    %c0_5 = arith.constant 0 : index
    %c0_6 = arith.constant 0 : index
    %5 = vector.load %arg0[%c0_5, %c0_6] : memref<16x8xf32, #tpu.memory_space<vmem>>, vector<16x8xf32>
    %cst = arith.constant dense<0.000000e+00> : vector<16x128xf32>
    %6 = tpu.matmul %5, %1, %cst {dimension_numbers = #tpu.dot_dimension_numbers<[1], [0], [0], [1], [0, 0, 1, 1], [], []>} : vector<16x8xf32>, vector<8x128xf32>, vector<16x128xf32> -> vector<16x128xf32>
    %7 = vector.broadcast %2 : vector<1x128xf32> to vector<16x128xf32>
    %8 = arith.addf %6, %7 : vector<16x128xf32>
    %cst_7 = arith.constant 0.000000e+00 : f32
    %9 = vector.broadcast %cst_7 : f32 to vector<2x128xf32>
    %10 = vector.extract_strided_slice %8 {offsets = [0, 0], sizes = [2, 128], strides = [1, 1]} : vector<16x128xf32> to vector<2x128xf32>
    %cst_8 = arith.constant dense<0.000000e+00> : vector<2x128xf32>
    %11 = tpu.matmul %9, %0, %cst_8 {dimension_numbers = #tpu.dot_dimension_numbers<[1], [0], [0], [1], [0, 0, 1, 1], [], []>} : vector<2x128xf32>, vector<128x128xf32>, vector<2x128xf32> -> vector<2x128xf32>
    %12 = arith.addf %11, %10 : vector<2x128xf32>
    %13 = math.tanh %12 : vector<2x128xf32>
    %c139 = arith.constant 139 : index
    %c0_9 = arith.constant 0 : index
    %14 = vector.load %arg1[%c139, %c0_9] : memref<144x128xf32, #tpu.memory_space<vmem>>, vector<1x128xf32>
    %15 = arith.subf %13, %9 : vector<2x128xf32>
    %16 = vector.broadcast %14 : vector<1x128xf32> to vector<2x128xf32>
    %17 = arith.mulf %16, %15 : vector<2x128xf32>
    %18 = arith.addf %9, %17 : vector<2x128xf32>
    %19 = vector.extract_strided_slice %8 {offsets = [2, 0], sizes = [2, 128], strides = [1, 1]} : vector<16x128xf32> to vector<2x128xf32>
    %cst_10 = arith.constant dense<0.000000e+00> : vector<2x128xf32>
    %20 = tpu.matmul %18, %0, %cst_10 {dimension_numbers = #tpu.dot_dimension_numbers<[1], [0], [0], [1], [0, 0, 1, 1], [], []>} : vector<2x128xf32>, vector<128x128xf32>, vector<2x128xf32> -> vector<2x128xf32>
    %21 = arith.addf %20, %19 : vector<2x128xf32>
    %22 = math.tanh %21 : vector<2x128xf32>
    %c140 = arith.constant 140 : index
    %c0_11 = arith.constant 0 : index
    %23 = vector.load %arg1[%c140, %c0_11] : memref<144x128xf32, #tpu.memory_space<vmem>>, vector<1x128xf32>
    %24 = arith.subf %22, %18 : vector<2x128xf32>
    %25 = vector.broadcast %23 : vector<1x128xf32> to vector<2x128xf32>
    %26 = arith.mulf %25, %24 : vector<2x128xf32>
    %27 = arith.addf %18, %26 : vector<2x128xf32>
    %28 = vector.extract_strided_slice %8 {offsets = [4, 0], sizes = [2, 128], strides = [1, 1]} : vector<16x128xf32> to vector<2x128xf32>
    %cst_12 = arith.constant dense<0.000000e+00> : vector<2x128xf32>
    %29 = tpu.matmul %27, %0, %cst_12 {dimension_numbers = #tpu.dot_dimension_numbers<[1], [0], [0], [1], [0, 0, 1, 1], [], []>} : vector<2x128xf32>, vector<128x128xf32>, vector<2x128xf32> -> vector<2x128xf32>
    %30 = arith.addf %29, %28 : vector<2x128xf32>
    %31 = math.tanh %30 : vector<2x128xf32>
    %32 = vector.extract_strided_slice %8 {offsets = [6, 0], sizes = [2, 128], strides = [1, 1]} : vector<16x128xf32> to vector<2x128xf32>
    %cst_13 = arith.constant dense<0.000000e+00> : vector<2x128xf32>
    %33 = tpu.matmul %31, %0, %cst_13 {dimension_numbers = #tpu.dot_dimension_numbers<[1], [0], [0], [1], [0, 0, 1, 1], [], []>} : vector<2x128xf32>, vector<128x128xf32>, vector<2x128xf32> -> vector<2x128xf32>
    %34 = arith.addf %33, %32 : vector<2x128xf32>
    %35 = math.tanh %34 : vector<2x128xf32>
    %36 = vector.extract_strided_slice %8 {offsets = [8, 0], sizes = [2, 128], strides = [1, 1]} : vector<16x128xf32> to vector<2x128xf32>
    %cst_14 = arith.constant dense<0.000000e+00> : vector<2x128xf32>
    %37 = tpu.matmul %35, %0, %cst_14 {dimension_numbers = #tpu.dot_dimension_numbers<[1], [0], [0], [1], [0, 0, 1, 1], [], []>} : vector<2x128xf32>, vector<128x128xf32>, vector<2x128xf32> -> vector<2x128xf32>
    %38 = arith.addf %37, %36 : vector<2x128xf32>
    %39 = math.tanh %38 : vector<2x128xf32>
    %40 = vector.extract_strided_slice %8 {offsets = [10, 0], sizes = [2, 128], strides = [1, 1]} : vector<16x128xf32> to vector<2x128xf32>
    %cst_15 = arith.constant dense<0.000000e+00> : vector<2x128xf32>
    %41 = tpu.matmul %39, %0, %cst_15 {dimension_numbers = #tpu.dot_dimension_numbers<[1], [0], [0], [1], [0, 0, 1, 1], [], []>} : vector<2x128xf32>, vector<128x128xf32>, vector<2x128xf32> -> vector<2x128xf32>
    %42 = arith.addf %41, %40 : vector<2x128xf32>
    %43 = math.tanh %42 : vector<2x128xf32>
    %44 = vector.extract_strided_slice %8 {offsets = [12, 0], sizes = [2, 128], strides = [1, 1]} : vector<16x128xf32> to vector<2x128xf32>
    %cst_16 = arith.constant dense<0.000000e+00> : vector<2x128xf32>
    %45 = tpu.matmul %43, %0, %cst_16 {dimension_numbers = #tpu.dot_dimension_numbers<[1], [0], [0], [1], [0, 0, 1, 1], [], []>} : vector<2x128xf32>, vector<128x128xf32>, vector<2x128xf32> -> vector<2x128xf32>
    %46 = arith.addf %45, %44 : vector<2x128xf32>
    %47 = math.tanh %46 : vector<2x128xf32>
    %48 = vector.extract_strided_slice %8 {offsets = [14, 0], sizes = [2, 128], strides = [1, 1]} : vector<16x128xf32> to vector<2x128xf32>
    %cst_17 = arith.constant dense<0.000000e+00> : vector<2x128xf32>
    %49 = tpu.matmul %47, %0, %cst_17 {dimension_numbers = #tpu.dot_dimension_numbers<[1], [0], [0], [1], [0, 0, 1, 1], [], []>} : vector<2x128xf32>, vector<128x128xf32>, vector<2x128xf32> -> vector<2x128xf32>
    %50 = arith.addf %49, %48 : vector<2x128xf32>
    %51 = math.tanh %50 : vector<2x128xf32>
    %cst_18 = arith.constant dense<0.000000e+00> : vector<2x128xf32>
    %52 = tpu.matmul %51, %0, %cst_18 {dimension_numbers = #tpu.dot_dimension_numbers<[1], [0], [0], [1], [0, 0, 1, 1], [], []>} : vector<2x128xf32>, vector<128x128xf32>, vector<2x128xf32> -> vector<2x128xf32>
    %53 = vector.broadcast %2 : vector<1x128xf32> to vector<2x128xf32>
    %54 = arith.addf %52, %53 : vector<2x128xf32>
    %55 = math.tanh %54 : vector<2x128xf32>
    %c141 = arith.constant 141 : index
    %c0_19 = arith.constant 0 : index
    %56 = vector.load %arg1[%c141, %c0_19] : memref<144x128xf32, #tpu.memory_space<vmem>>, vector<1x128xf32>
    %57 = arith.subf %55, %51 : vector<2x128xf32>
    %58 = vector.broadcast %56 : vector<1x128xf32> to vector<2x128xf32>
    %59 = arith.mulf %58, %57 : vector<2x128xf32>
    %60 = arith.addf %51, %59 : vector<2x128xf32>
    %cst_20 = arith.constant dense<0.000000e+00> : vector<2x128xf32>
    %61 = tpu.matmul %60, %0, %cst_20 {dimension_numbers = #tpu.dot_dimension_numbers<[1], [0], [0], [1], [0, 0, 1, 1], [], []>} : vector<2x128xf32>, vector<128x128xf32>, vector<2x128xf32> -> vector<2x128xf32>
    %62 = vector.broadcast %2 : vector<1x128xf32> to vector<2x128xf32>
    %63 = arith.addf %61, %62 : vector<2x128xf32>
    %64 = math.tanh %63 : vector<2x128xf32>
    %c142 = arith.constant 142 : index
    %c0_21 = arith.constant 0 : index
    %65 = vector.load %arg1[%c142, %c0_21] : memref<144x128xf32, #tpu.memory_space<vmem>>, vector<1x128xf32>
    %66 = arith.subf %64, %60 : vector<2x128xf32>
    %67 = vector.broadcast %65 : vector<1x128xf32> to vector<2x128xf32>
    %68 = arith.mulf %67, %66 : vector<2x128xf32>
    %69 = arith.addf %60, %68 : vector<2x128xf32>
    %70 = vector.broadcast %3 : vector<1x128xf32> to vector<2x128xf32>
    %71 = arith.mulf %69, %70 : vector<2x128xf32>
    %cst_22 = arith.constant dense<0.000000e+00> : vector<2xf32>
    %72 = vector.multi_reduction <add>, %71, %cst_22 [1] : vector<2x128xf32> to vector<2xf32>
    %73 = vector.shape_cast %72 : vector<2xf32> to vector<2x1xf32>
    %74 = vector.broadcast %73 : vector<2x1xf32> to vector<2x128xf32>
    %75 = vector.broadcast %4 : vector<1x128xf32> to vector<2x128xf32>
    %76 = arith.addf %74, %75 : vector<2x128xf32>
    %c0_23 = arith.constant 0 : index
    %c0_24 = arith.constant 0 : index
    %77 = vector.load %arg2[%c0_23, %c0_24] : memref<2x128xf32, #tpu.memory_space<vmem>>, vector<2x128xf32>
    tpu.vector_store %arg2[%c0_23, %c0_24], %76 {strides = array<i32>} : memref<2x128xf32, #tpu.memory_space<vmem>>, vector<2x128xf32>,
    return
  }
}

</mosaic_0001>

<bundles_post_ra>
// kernel: price_predictor_forward.1
= control target key start
LH: loop header
LB: loop body
LE: loop exit
PB: predicated region body
PF: predicated region fallthrough
CT: control target
= control target key end

     0   :  { %7 = vsyncpa [#allocation3], 0  ;;  %s1735_s9 = smov [#allocation2]   ;;  %s1995_s0 = inlined_call_operand.vmem [shape: f32[16,8], index: 0, kind: input, shape index: {}]   ;;  %s1996_s1 = inlined_call_operand.hbm [shape: f32[144,128], index: 1, kind: input, shape index: {}]   ;;  %s1997_s2 = inlined_call_operand.vmem [shape: f32[2,128], index: 2, kind: output, shape index: {}]  }
   0x1   :  { %s15_s10 = sshll.u32 %s1735_s9, 4  ;;  %s1711_s13 = scalar_lea.hbm %s1996_s1, 2304  ;;  %s16_s10 = int_to_ptr.vmem [resolvable:$true] %s15_s10 }
   0x2   :  { %p1712_p0 = scmp.ne.s32.totalorder %s1996_s1, %s1711_s13  ;;  %p1715_p1 = scmp.lt.u32.totalorder %s1711_s13, %s1996_s1 }
   0x4   :  { %p1717_p2 = pnand %p1715_p1, %p1712_p0 }
   0x6   :  { %1720 = shalt.err (!%p1717_p2)
}
   0x7   :  { %s1721_s18 = scalar_lea.vmem %s16_s10, 2304  ;;  %p1726_p4 = scmp.lt.s32.totalorder %s16_s10, %s16_s10 }
   0x8   :  { %p1722_p3 = scmp.ne.s32.totalorder %s16_s10, %s1721_s18  ;;  %p1727_p5 = scmp.lt.s32.totalorder %s1721_s18, %s1721_s18 }
   0xa   :  { %p1728_p6 = por %p1727_p5, %p1726_p4 }
   0xc   :  { %p1729_p7 = pnand %p1728_p6, %p1722_p3 }
   0xe   :  { %1732 = shalt.err (!%p1729_p7)
}
   0xf   :  { %s1736_s19 = smov 128   ;;  %s1737_s20 = smov 8  }
  0x10   :  { %21 = dma.hbm_to_vmem [thread:$0]  %s1996_s1, 2304, %s16_s10, [#allocation3], %s1736_s19, %s1736_s19, %s1737_s20  }
  0x11   :  { %1733 = dma.done.wait [#allocation3], 2304  }
  0x12   :  { %1734 = vsyncadd [#allocation3], 4294964992  ;;  %v1738_v0 = vmov 0.0|0.0   ;;  %vm1739_vm0 = vmmov 0   ;;  %v1740_v1 = vmov 0.0   ;;  %v25_v2 = vld [vmem:[#allocation2] sm:$0xff] }
  0x13   :  { %1445 = vmatprep.subr.bf16.mxu1 %v1738_v0  ;;  %1127 = vmatprep.mubr.msk.f32.mxu1 %vm1739_vm0, %v1740_v1  ;;  %v26_v3 = vld [vmem:[#allocation2 + $0x8] sm:$0xff]  ;;  %v27_v4 = vld [vmem:[#allocation2 + $0x10] sm:$0xff]  ;;  %v28_v6 = vld [vmem:[#allocation2 + $0x18] sm:$0xff]  ;;  %vm51_vm1 = vcmask 64512   ;;  %vm893_vm2 = vcmask 1041408  }
  0x14   :  { %v1771_v5 = vpack.c.bf16 %v26_v3, %v25_v2  ;;  %v1774_v7 = vpack.c.bf16 %v28_v6, %v27_v4  ;;  %v29_v8 = vld [vmem:[#allocation2 + $0x20] sm:$0xff]  ;;  %v30_v9 = vld [vmem:[#allocation2 + $0x28] sm:$0xff]  ;;  %v31_v14 = vld [vmem:[#allocation2 + $0x30] sm:$0xff] }
  0x15   :  { %v41_v10 = vld [vmem:[#allocation2 + $0x80] sm:$0xff]  ;;  %v46_v12 = vld [vmem:[%s1995_s0 + $0x8] sm:$0xff]  ;;  %v1784_v13 = vpack.c.bf16 %v30_v9, %v29_v8  ;;  %v32_v15 = vld [vmem:[#allocation2 + $0x38] sm:$0xff] }
  0x16   :  { %1447 = vmatpush3.bf16.msra.mxu1 %v1771_v5  ;;  %1090 = vmatprep.subr.mxu0 %v41_v10  ;;  %v45_v11 = vld [vmem:[%s1995_s0] sm:$0xff]  ;;  %v1793_v16 = vpack.c.bf16 %v32_v15, %v31_v14  ;;  %v34_v18 = vld [vmem:[#allocation2 + $0x48] sm:$0xff]  ;;  %v35_v20 = vld [vmem:[#allocation2 + $0x50] sm:$0xff] }
  0x17   :  { %1448 = vmatprep.subr.bf16.mxu1 %v1738_v0  ;;  %1091 = vmatpush3.msra.mxu0 %v41_v10  ;;  %v33_v17 = vld [vmem:[#allocation2 + $0x40] sm:$0xff]  ;;  %v36_v21 = vld [vmem:[#allocation2 + $0x58] sm:$0xff]  ;;  %v38_v24 = vld [vmem:[#allocation2 + $0x68] sm:$0xff] }
  0x18   :  { %1092 = vmatprep.mubr.msk.f32.mxu0 %vm51_vm1, %v45_v11  ;;  %1469 = vmatprep.subr.bf16.mxu0 %v1738_v0  ;;  %v1799_v19 = vpack.c.bf16 %v34_v18, %v33_v17  ;;  %v1805_v22 = vpack.c.bf16 %v36_v21, %v35_v20  ;;  %v37_v23 = vld [vmem:[#allocation2 + $0x60] sm:$0xff]  ;;  %v39_v26 = vld [vmem:[#allocation2 + $0x70] sm:$0xff]  ;;  %v40_v27 = vld [vmem:[#allocation2 + $0x78] sm:$0xff] }
  0x19   :  { %1093 = vmatmul.mubr.msk.f32.vlgmr.msra.gmra.mrb[0].mxu0 %vm51_vm1, %v46_v12  ;;  %v1811_v25 = vpack.c.bf16 %v38_v24, %v37_v23  ;;  %v1817_v28 = vpack.c.bf16 %v40_v27, %v39_v26  ;;  %v1849_v31 = vld [vmem:[#allocation2 + $0x88] ss:$0 sm:$0xff]  ;;  %v911_v36 = vld [vmem:[#allocation2 + $0x8b] ss:$0 sm:$0xff]  ;;  %v912_v44 = vld [vmem:[#allocation2 + $0x8c] ss:$0 sm:$0xff] }
  0x1a   :  { %1450 = vmatpush3.bf16.msra.mxu1 %v1774_v7  ;;  %1471 = vmatpush3.bf16.msra.mxu0 %v1771_v5  ;;  %v914_v26 = vld [vmem:[#allocation2 + $0x8e] ss:$0 sm:$0xff] }
  0x1b   :  { %1451 = vmatprep.subr.bf16.mxu1 %v1738_v0  ;;  %1162 = vmatprep.mubr.msk.f32.mxu0 %vm1739_vm0, %v1740_v1 }
  0x1c   :  { %1472 = vmatprep.subr.bf16.mxu0 %v1738_v0 }
  0x1e   :  { %1453 = vmatpush3.bf16.msra.mxu1 %v1784_v13  ;;  %1474 = vmatpush3.bf16.msra.mxu0 %v1774_v7 }
  0x1f   :  { %1454 = vmatprep.subr.bf16.mxu1 %v1738_v0  ;;  %1475 = vmatprep.subr.bf16.mxu0 %v1738_v0 }
  0x22   :  { %1456 = vmatpush3.bf16.msra.mxu1 %v1793_v16  ;;  %1477 = vmatpush3.bf16.msra.mxu0 %v1784_v13 }
  0x23   :  { %1457 = vmatprep.subr.bf16.mxu1 %v1738_v0  ;;  %1478 = vmatprep.subr.bf16.mxu0 %v1738_v0 }
  0x26   :  { %1459 = vmatpush3.bf16.msra.mxu1 %v1799_v19  ;;  %1480 = vmatpush3.bf16.msra.mxu0 %v1793_v16 }
  0x27   :  { %1460 = vmatprep.subr.bf16.mxu1 %v1738_v0  ;;  %1481 = vmatprep.subr.bf16.mxu0 %v1738_v0 }
  0x2a   :  { %1462 = vmatpush3.bf16.msra.mxu1 %v1805_v22  ;;  %1483 = vmatpush3.bf16.msra.mxu0 %v1799_v19 }
  0x2b   :  { %1463 = vmatprep.subr.bf16.mxu1 %v1738_v0  ;;  %1484 = vmatprep.subr.bf16.mxu0 %v1738_v0 }
  0x2e   :  { %1465 = vmatpush3.bf16.msra.mxu1 %v1811_v25  ;;  %1486 = vmatpush3.bf16.msra.mxu0 %v1805_v22 }
  0x2f   :  { %1466 = vmatprep.subr.bf16.mxu1 %v1738_v0  ;;  %1487 = vmatprep.subr.bf16.mxu0 %v1738_v0 }
  0x32   :  { %1468 = vmatpush3.bf16.msra.mxu1 %v1817_v28  ;;  %1489 = vmatpush3.bf16.msra.mxu0 %v1811_v25 }
  0x33   :  { %1493 = vmatprep.subr.bf16.mxu1 %v1738_v0  ;;  %1490 = vmatprep.subr.bf16.mxu0 %v1738_v0 }
  0x35   :  { %1128 = vmatmul.mubr.f32.vlgmr.msra.gmra.mrb[0].mxu1 %v1740_v1 }
  0x36   :  { %1495 = vmatpush3.bf16.msra.mxu1 %v1771_v5  ;;  %1197 = vmatprep.mubr.msk.f32.mxu1 %vm1739_vm0, %v1740_v1 }
  0x37   :  { %1496 = vmatprep.subr.bf16.mxu1 %v1738_v0  ;;  %1492 = vmatpush3.bf16.msra.mxu0 %v1817_v28 }
  0x38   :  { %1517 = vmatprep.subr.bf16.mxu0 %v1738_v0 }
  0x3a   :  { %1498 = vmatpush3.bf16.msra.mxu1 %v1774_v7 }
  0x3b   :  { %1499 = vmatprep.subr.bf16.mxu1 %v1738_v0 }
  0x3e   :  { %1501 = vmatpush3.bf16.msra.mxu1 %v1784_v13 }
  0x3f   :  { %1502 = vmatprep.subr.bf16.mxu1 %v1738_v0 }
  0x42   :  { %1504 = vmatpush3.bf16.msra.mxu1 %v1793_v16 }
  0x43   :  { %1505 = vmatprep.subr.bf16.mxu1 %v1738_v0 }
  0x46   :  { %1507 = vmatpush3.bf16.msra.mxu1 %v1799_v19 }
  0x47   :  { %1508 = vmatprep.subr.bf16.mxu1 %v1738_v0 }
  0x4a   :  { %1510 = vmatpush3.bf16.msra.mxu1 %v1805_v22 }
  0x4b   :  { %1511 = vmatprep.subr.bf16.mxu1 %v1738_v0 }
  0x4e   :  { %1513 = vmatpush3.bf16.msra.mxu1 %v1811_v25 }
  0x4f   :  { %1514 = vmatprep.subr.bf16.mxu1 %v1738_v0 }
  0x52   :  { %1516 = vmatpush3.bf16.msra.mxu1 %v1817_v28 }
  0x53   :  { %1541 = vmatprep.subr.bf16.mxu1 %v1738_v0 }
  0xec   :  { %v1847_v29 = vpop.f32.mrb[0].mxu0 }
  0xed   :  { %v124_v30 = vpop.f32.mrb[1].mxu0  ;;  %v1932_v58 = vadd.f32 %v1847_v29, %v1849_v31  ;;  %v915_v29 = vld [vmem:[#allocation2 + $0x89] ss:$0 sm:$0xff] }
  0xee   :  { %v1852_v32 = vadd.f32 %v1849_v31, %v124_v30 }
  0xef   :  { %v511_v63 = vrot.slane %v1932_v58, 2  ;;  %v584_v8 = vrot.slane %v1932_v58, 4 }
  0xf0   :  { %v212_v39 = vrot.slane %v1852_v32, 2  ;;  %v293_v48 = vrot.slane %v1852_v32, 4  ;;  %v366_v53 = vrot.slane %v1852_v32, 6 }
 0x108   :  { %v199_v33 = vpop.f32.mrb[0].mxu1 }
 0x109   :  { %v200_v34 = vadd.f32 %v199_v33, %v1852_v32  ;;  %v1129_v35 = vpop.f32.mrb[1].mxu1 }
 0x10b   :  { %1691 = vtanh.f32 %v200_v34  ;;  %v916_v34 = vld [vmem:[#allocation2 + $0x8a] ss:$0 sm:$0xff] }
 0x115   :  { %v1692_v37 = vpop.eup %1691 }
 0x116   :  { %v209_v38 = vmul.f32 %v1692_v37, %v911_v36 }
 0x118   :  { %1163 = vmatmul.mubr.f32.vlgmr.msra.gmra.mrb[2].mxu0 %v209_v38 }
 0x119   :  { %1519 = vmatpush3.bf16.msra.mxu0 %v1771_v5  ;;  %1232 = vmatprep.mubr.msk.f32.mxu0 %vm1739_vm0, %v1740_v1 }
 0x11a   :  { %1520 = vmatprep.subr.bf16.mxu0 %v1738_v0 }
 0x11d   :  { %1522 = vmatpush3.bf16.msra.mxu0 %v1774_v7 }
 0x11e   :  { %1523 = vmatprep.subr.bf16.mxu0 %v1738_v0 }
 0x121   :  { %1525 = vmatpush3.bf16.msra.mxu0 %v1784_v13 }
 0x122   :  { %1526 = vmatprep.subr.bf16.mxu0 %v1738_v0 }
 0x125   :  { %1528 = vmatpush3.bf16.msra.mxu0 %v1793_v16 }
 0x126   :  { %1529 = vmatprep.subr.bf16.mxu0 %v1738_v0 }
 0x129   :  { %1531 = vmatpush3.bf16.msra.mxu0 %v1799_v19 }
 0x12a   :  { %1532 = vmatprep.subr.bf16.mxu0 %v1738_v0 }
 0x12d   :  { %1534 = vmatpush3.bf16.msra.mxu0 %v1805_v22 }
 0x12e   :  { %1535 = vmatprep.subr.bf16.mxu0 %v1738_v0 }
 0x131   :  { %1537 = vmatpush3.bf16.msra.mxu0 %v1811_v25 }
 0x132   :  { %1538 = vmatprep.subr.bf16.mxu0 %v1738_v0 }
 0x135   :  { %1540 = vmatpush3.bf16.msra.mxu0 %v1817_v28 }
 0x136   :  { %1565 = vmatprep.subr.bf16.mxu0 %v1738_v0 }
 0x1eb   :  { %v280_v40 = vpop.f32.mrb[2].mxu0 }
 0x1ec   :  { %v281_v41 = vadd.f32 %v280_v40, %v212_v39  ;;  %v1164_v42 = vpop.f32.mrb[3].mxu0 }
 0x1ee   :  { %1693 = vtanh.f32 %v281_v41 }
 0x1f8   :  { %v1694_v43 = vpop.eup %1693 }
 0x1f9   :  { %v286_v45 = vsub.f32 %v1694_v43, %v209_v38 }
 0x1fb   :  { %v291_v46 = vmul.f32 %v912_v44, %v286_v45 }
 0x1fd   :  { %v292_v47 = vadd.f32 %v291_v46, %v209_v38 }
 0x1ff   :  { %1198 = vmatmul.mubr.f32.vlgmr.msra.gmra.mrb[2].mxu1 %v292_v47 }
 0x200   :  { %1543 = vmatpush3.bf16.msra.mxu1 %v1771_v5  ;;  %1267 = vmatprep.mubr.msk.f32.mxu1 %vm1739_vm0, %v1740_v1 }
 0x201   :  { %1544 = vmatprep.subr.bf16.mxu1 %v1738_v0 }
 0x204   :  { %1546 = vmatpush3.bf16.msra.mxu1 %v1774_v7 }
 0x205   :  { %1547 = vmatprep.subr.bf16.mxu1 %v1738_v0 }
 0x208   :  { %1549 = vmatpush3.bf16.msra.mxu1 %v1784_v13 }
 0x209   :  { %1550 = vmatprep.subr.bf16.mxu1 %v1738_v0 }
 0x20c   :  { %1552 = vmatpush3.bf16.msra.mxu1 %v1793_v16 }
 0x20d   :  { %1553 = vmatprep.subr.bf16.mxu1 %v1738_v0 }
 0x210   :  { %1555 = vmatpush3.bf16.msra.mxu1 %v1799_v19 }
 0x211   :  { %1556 = vmatprep.subr.bf16.mxu1 %v1738_v0 }
 0x214   :  { %1558 = vmatpush3.bf16.msra.mxu1 %v1805_v22 }
 0x215   :  { %1559 = vmatprep.subr.bf16.mxu1 %v1738_v0 }
 0x218   :  { %1561 = vmatpush3.bf16.msra.mxu1 %v1811_v25 }
 0x219   :  { %1562 = vmatprep.subr.bf16.mxu1 %v1738_v0 }
 0x21c   :  { %1564 = vmatpush3.bf16.msra.mxu1 %v1817_v28 }
 0x21d   :  { %1589 = vmatprep.subr.bf16.mxu1 %v1738_v0 }
 0x2d2   :  { %v361_v49 = vpop.f32.mrb[2].mxu1 }
 0x2d3   :  { %v362_v50 = vadd.f32 %v361_v49, %v293_v48  ;;  %v1199_v51 = vpop.f32.mrb[3].mxu1 }
 0x2d5   :  { %1695 = vtanh.f32 %v362_v50 }
 0x2df   :  { %v1696_v52 = vpop.eup %1695 }
 0x2e0   :  { %1233 = vmatmul.mubr.f32.vlgmr.msra.gmra.mrb[4].mxu0 %v1696_v52 }
 0x2e1   :  { %1567 = vmatpush3.bf16.msra.mxu0 %v1771_v5  ;;  %1302 = vmatprep.mubr.msk.f32.mxu0 %vm1739_vm0, %v1740_v1 }
 0x2e2   :  { %1568 = vmatprep.subr.bf16.mxu0 %v1738_v0 }
 0x2e5   :  { %1570 = vmatpush3.bf16.msra.mxu0 %v1774_v7 }
 0x2e6   :  { %1571 = vmatprep.subr.bf16.mxu0 %v1738_v0 }
 0x2e9   :  { %1573 = vmatpush3.bf16.msra.mxu0 %v1784_v13 }
 0x2ea   :  { %1574 = vmatprep.subr.bf16.mxu0 %v1738_v0 }
 0x2ed   :  { %1576 = vmatpush3.bf16.msra.mxu0 %v1793_v16 }
 0x2ee   :  { %1577 = vmatprep.subr.bf16.mxu0 %v1738_v0 }
 0x2f1   :  { %1579 = vmatpush3.bf16.msra.mxu0 %v1799_v19 }
 0x2f2   :  { %1580 = vmatprep.subr.bf16.mxu0 %v1738_v0 }
 0x2f5   :  { %1582 = vmatpush3.bf16.msra.mxu0 %v1805_v22 }
 0x2f6   :  { %1583 = vmatprep.subr.bf16.mxu0 %v1738_v0 }
 0x2f9   :  { %1585 = vmatpush3.bf16.msra.mxu0 %v1811_v25 }
 0x2fa   :  { %1586 = vmatprep.subr.bf16.mxu0 %v1738_v0 }
 0x2fd   :  { %1588 = vmatpush3.bf16.msra.mxu0 %v1817_v28 }
 0x2fe   :  { %1613 = vmatprep.subr.bf16.mxu0 %v1738_v0 }
 0x3b3   :  { %v434_v54 = vpop.f32.mrb[4].mxu0 }
 0x3b4   :  { %v435_v55 = vadd.f32 %v434_v54, %v366_v53  ;;  %v1234_v56 = vpop.f32.mrb[5].mxu0 }
 0x3b6   :  { %1697 = vtanh.f32 %v435_v55 }
 0x3c0   :  { %v1698_v57 = vpop.eup %1697 }
 0x3c1   :  { %1268 = vmatmul.mubr.f32.vlgmr.msra.gmra.mrb[4].mxu1 %v1698_v57 }
 0x3c2   :  { %1591 = vmatpush3.bf16.msra.mxu1 %v1771_v5  ;;  %1337 = vmatprep.mubr.msk.f32.mxu1 %vm1739_vm0, %v1740_v1 }
 0x3c3   :  { %1592 = vmatprep.subr.bf16.mxu1 %v1738_v0 }
 0x3c6   :  { %1594 = vmatpush3.bf16.msra.mxu1 %v1774_v7 }
 0x3c7   :  { %1595 = vmatprep.subr.bf16.mxu1 %v1738_v0 }
 0x3ca   :  { %1597 = vmatpush3.bf16.msra.mxu1 %v1784_v13 }
 0x3cb   :  { %1598 = vmatprep.subr.bf16.mxu1 %v1738_v0 }
 0x3ce   :  { %1600 = vmatpush3.bf16.msra.mxu1 %v1793_v16 }
 0x3cf   :  { %1601 = vmatprep.subr.bf16.mxu1 %v1738_v0 }
 0x3d2   :  { %1603 = vmatpush3.bf16.msra.mxu1 %v1799_v19 }
 0x3d3   :  { %1604 = vmatprep.subr.bf16.mxu1 %v1738_v0 }
 0x3d6   :  { %1606 = vmatpush3.bf16.msra.mxu1 %v1805_v22 }
 0x3d7   :  { %1607 = vmatprep.subr.bf16.mxu1 %v1738_v0 }
 0x3da   :  { %1609 = vmatpush3.bf16.msra.mxu1 %v1811_v25 }
 0x3db   :  { %1610 = vmatprep.subr.bf16.mxu1 %v1738_v0 }
 0x3de   :  { %1612 = vmatpush3.bf16.msra.mxu1 %v1817_v28 }
 0x3df   :  { %1637 = vmatprep.subr.bf16.mxu1 %v1738_v0 }
 0x494   :  { %v505_v59 = vpop.f32.mrb[4].mxu1 }
 0x495   :  { %v506_v60 = vadd.f32 %v505_v59, %v1932_v58  ;;  %v1269_v61 = vpop.f32.mrb[5].mxu1 }
 0x497   :  { %1699 = vtanh.f32 %v506_v60 }
 0x4a1   :  { %v1700_v62 = vpop.eup %1699 }
 0x4a2   :  { %1303 = vmatmul.mubr.f32.vlgmr.msra.gmra.mrb[6].mxu0 %v1700_v62 }
 0x4a3   :  { %1615 = vmatpush3.bf16.msra.mxu0 %v1771_v5  ;;  %1372 = vmatprep.mubr.msk.f32.mxu0 %vm1739_vm0, %v1740_v1 }
 0x4a4   :  { %1616 = vmatprep.subr.bf16.mxu0 %v1738_v0 }
 0x4a7   :  { %1618 = vmatpush3.bf16.msra.mxu0 %v1774_v7 }
 0x4a8   :  { %1619 = vmatprep.subr.bf16.mxu0 %v1738_v0 }
 0x4ab   :  { %1621 = vmatpush3.bf16.msra.mxu0 %v1784_v13 }
 0x4ac   :  { %1622 = vmatprep.subr.bf16.mxu0 %v1738_v0 }
 0x4af   :  { %1624 = vmatpush3.bf16.msra.mxu0 %v1793_v16 }
 0x4b0   :  { %1625 = vmatprep.subr.bf16.mxu0 %v1738_v0 }
 0x4b3   :  { %1627 = vmatpush3.bf16.msra.mxu0 %v1799_v19 }
 0x4b4   :  { %1628 = vmatprep.subr.bf16.mxu0 %v1738_v0 }
 0x4b7   :  { %1630 = vmatpush3.bf16.msra.mxu0 %v1805_v22 }
 0x4b8   :  { %1631 = vmatprep.subr.bf16.mxu0 %v1738_v0 }
 0x4bb   :  { %1633 = vmatpush3.bf16.msra.mxu0 %v1811_v25 }
 0x4bc   :  { %1634 = vmatprep.subr.bf16.mxu0 %v1738_v0 }
 0x4bf   :  { %1636 = vmatpush3.bf16.msra.mxu0 %v1817_v28 }
 0x4c0   :  { %1661 = vmatprep.subr.bf16.mxu0 %v1738_v0 }
 0x575   :  { %v579_v2 = vpop.f32.mrb[6].mxu0 }
 0x576   :  { %v580_v3 = vadd.f32 %v579_v2, %v511_v63  ;;  %v1304_v4 = vpop.f32.mrb[7].mxu0 }
 0x578   :  { %1701 = vtanh.f32 %v580_v3 }
 0x582   :  { %v1702_v6 = vpop.eup %1701 }
 0x583   :  { %1338 = vmatmul.mubr.f32.vlgmr.msra.gmra.mrb[6].mxu1 %v1702_v6 }
 0x584   :  { %1639 = vmatpush3.bf16.msra.mxu1 %v1771_v5  ;;  %1407 = vmatprep.mubr.msk.f32.mxu1 %vm1739_vm0, %v1740_v1 }
 0x585   :  { %1640 = vmatprep.subr.bf16.mxu1 %v1738_v0 }
 0x588   :  { %1642 = vmatpush3.bf16.msra.mxu1 %v1774_v7 }
 0x589   :  { %1643 = vmatprep.subr.bf16.mxu1 %v1738_v0 }
 0x58c   :  { %1645 = vmatpush3.bf16.msra.mxu1 %v1784_v13 }
 0x58d   :  { %1646 = vmatprep.subr.bf16.mxu1 %v1738_v0 }
 0x590   :  { %1648 = vmatpush3.bf16.msra.mxu1 %v1793_v16 }
 0x591   :  { %1649 = vmatprep.subr.bf16.mxu1 %v1738_v0 }
 0x594   :  { %1651 = vmatpush3.bf16.msra.mxu1 %v1799_v19 }
 0x595   :  { %1652 = vmatprep.subr.bf16.mxu1 %v1738_v0 }
 0x598   :  { %1654 = vmatpush3.bf16.msra.mxu1 %v1805_v22 }
 0x599   :  { %1655 = vmatprep.subr.bf16.mxu1 %v1738_v0 }
 0x59c   :  { %1657 = vmatpush3.bf16.msra.mxu1 %v1811_v25 }
 0x59d   :  { %1658 = vmatprep.subr.bf16.mxu1 %v1738_v0 }
 0x5a0   :  { %1660 = vmatpush3.bf16.msra.mxu1 %v1817_v28 }
 0x656   :  { %v652_v9 = vpop.f32.mrb[6].mxu1 }
 0x657   :  { %v653_v10 = vadd.f32 %v652_v9, %v584_v8  ;;  %v1339_v11 = vpop.f32.mrb[7].mxu1 }
 0x659   :  { %1703 = vtanh.f32 %v653_v10 }
 0x663   :  { %v1704_v12 = vpop.eup %1703 }
 0x664   :  { %1373 = vmatmul.mubr.f32.vlgmr.msra.gmra.mrb[8].mxu0 %v1704_v12 }
 0x665   :  { %1663 = vmatpush3.bf16.msra.mxu0 %v1771_v5  ;;  %1442 = vmatprep.mubr.msk.f32.mxu0 %vm1739_vm0, %v1740_v1  ;;  %v657_v1 = vrot.slane %v1932_v58, 6 }
 0x666   :  { %1664 = vmatprep.subr.bf16.mxu0 %v1738_v0 }
 0x669   :  { %1666 = vmatpush3.bf16.msra.mxu0 %v1774_v7 }
 0x66a   :  { %1667 = vmatprep.subr.bf16.mxu0 %v1738_v0 }
 0x66d   :  { %1669 = vmatpush3.bf16.msra.mxu0 %v1784_v13 }
 0x66e   :  { %1670 = vmatprep.subr.bf16.mxu0 %v1738_v0 }
 0x671   :  { %1672 = vmatpush3.bf16.msra.mxu0 %v1793_v16 }
 0x672   :  { %1673 = vmatprep.subr.bf16.mxu0 %v1738_v0 }
 0x675   :  { %1675 = vmatpush3.bf16.msra.mxu0 %v1799_v19  ;;  %v913_v19 = vld [vmem:[#allocation2 + $0x8d] ss:$0 sm:$0xff] }
 0x676   :  { %1676 = vmatprep.subr.bf16.mxu0 %v1738_v0 }
 0x679   :  { %1678 = vmatpush3.bf16.msra.mxu0 %v1805_v22 }
 0x67a   :  { %1679 = vmatprep.subr.bf16.mxu0 %v1738_v0 }
 0x67d   :  { %1681 = vmatpush3.bf16.msra.mxu0 %v1811_v25 }
 0x67e   :  { %1682 = vmatprep.subr.bf16.mxu0 %v1738_v0 }
 0x681   :  { %1684 = vmatpush3.bf16.msra.mxu0 %v1817_v28 }
 0x737   :  { %v725_v5 = vpop.f32.mrb[8].mxu0 }
 0x738   :  { %v726_v7 = vadd.f32 %v725_v5, %v657_v1  ;;  %v1374_v13 = vpop.f32.mrb[9].mxu0 }
 0x73a   :  { %1705 = vtanh.f32 %v726_v7 }
 0x744   :  { %v1706_v14 = vpop.eup %1705 }
 0x745   :  { %1408 = vmatmul.mubr.f32.vlgmr.msra.gmra.mrb[8].mxu1 %v1706_v14 }
 0x818   :  { %v796_v15 = vpop.f32.mrb[8].mxu1 }
 0x819   :  { %v797_v16 = vadd.f32 %v1849_v31, %v796_v15  ;;  %v1409_v17 = vpop.f32.mrb[9].mxu1 }
 0x81b   :  { %1707 = vtanh.f32 %v797_v16 }
 0x825   :  { %v1708_v18 = vpop.eup %1707 }
 0x826   :  { %v802_v20 = vsub.f32 %v1708_v18, %v1706_v14 }
 0x828   :  { %v807_v21 = vmul.f32 %v913_v19, %v802_v20 }
 0x82a   :  { %v808_v0 = vadd.f32 %v1706_v14, %v807_v21 }
 0x82c   :  { %1443 = vmatmul.mubr.f32.vlgmr.msra.gmra.mrb[10].mxu0 %v808_v0 }
 0x8ff   :  { %v875_v22 = vpop.f32.mrb[10].mxu0 }
 0x900   :  { %v876_v23 = vadd.f32 %v1849_v31, %v875_v22  ;;  %v1444_v24 = vpop.f32.mrb[11].mxu0 }
 0x902   :  { %1709 = vtanh.f32 %v876_v23 }
 0x90c   :  { %v1710_v25 = vpop.eup %1709 }
 0x90d   :  { %v881_v27 = vsub.f32 %v1710_v25, %v808_v0 }
 0x90f   :  { %v886_v28 = vmul.f32 %v914_v26, %v881_v27 }
 0x911   :  { %v887_v30 = vadd.f32 %v886_v28, %v808_v0 }
 0x913   :  { %v892_v32 = vmul.f32 %v915_v29, %v887_v30 }
 0x915   :  { %v894_v33 = vsel %vm893_vm2, %v892_v32, 0.0 }
 0x916   :  { %895 = vadd.xlane.f32.xlu0 %v894_v33 }
 0x9a3   :  { %v896_v35 = vpop.xlane.xlu0 %895 }
 0x9a4   :  { %v901_v36 = vadd.f32 %v916_v34, %v896_v35 }
 0x9a6   :  { %902 = vst [vmem:[%s1997_s2] sm:$0x3] %v901_v36 }
 0x9a7   :  { %907 = vsyncpa [#allocation3], 1 }

</bundles_post_ra>
